<compile_context>
chip_gen: v7x
topology: tpu7x:2x2x1
jax: 0.10.0
libtpu: 0.0.40
codegen_flags: <defaults>
</compile_context>

<pallas_src>
import functools
import math

import jax
import jax.numpy as jnp
from jax.experimental import pallas as pl
from jax.experimental.pallas import tpu as pltpu


_TILE_VMEM_BUDGET = 16 * 1024 * 1024   # bytes for in/out double-buffers + f32 temps
_VMEM_LIMIT_MIN = 32 * 1024 * 1024     # raise v5e's 16 MiB scoped default
_VMEM_LIMIT_MAX = 60 * 1024 * 1024     # stay under v7x's 64 MiB physical VMEM
_MAX_ROW_TILE = 1024                   # >=512 rows already ~85% of HBM roofline
_LANE = 128


def _sublane_granularity(dtype) -> int:
    itemsize = jnp.dtype(dtype).itemsize
    if itemsize >= 4:
        return 8
    if itemsize == 2:
        return 16      # bf16 packs (16,128) per vreg
    return 32          # int8/fp8-class packing


def _bytes_per_element_in_flight(dtype) -> int:
    # 2 double-buffered input tiles + 2 double-buffered output tiles (dtype)
    # + ~2 f32 temporaries (upcast x, exp) materialized inside the kernel.
    itemsize = jnp.dtype(dtype).itemsize
    return 4 * itemsize + 2 * 4


def _vmem_limit(tile_elems: int, dtype) -> int:
    needed = tile_elems * _bytes_per_element_in_flight(dtype) + (4 << 20)
    return int(min(_VMEM_LIMIT_MAX, max(_VMEM_LIMIT_MIN, needed)))


def _cost_estimate(n_elems: int, dtype) -> pl.CostEstimate:
    return pl.CostEstimate(
        flops=5 * n_elems,
        transcendentals=n_elems,
        bytes_accessed=2 * n_elems * jnp.dtype(dtype).itemsize,
    )


# ----------------------------------------------------------------------------
# Lane path: softmax over the last (lane) dimension of a (rows, feat) slab.
# ----------------------------------------------------------------------------
def _softmax_lane_kernel(x_ref, o_ref):
    x = x_ref[...].astype(jnp.float32)
    m = jnp.max(x, axis=-1, keepdims=True)
    e = jnp.exp(x - m)
    s = jnp.sum(e, axis=-1, keepdims=True)
    inv = pl.reciprocal(s, approx=False)        # per-row reciprocal + broadcast mul
    o_ref[...] = (e * inv).astype(o_ref.dtype)


def _softmax_lane(x2: jax.Array) -> jax.Array:
    rows, feat = x2.shape
    dtype = x2.dtype
    g = _sublane_granularity(dtype)
    bytes_per_row = max(1, feat * _bytes_per_element_in_flight(dtype))

    # Byte-budgeted row tile, rounded down to the sublane packing granularity.
    tile_r = max(g, min(_MAX_ROW_TILE, _TILE_VMEM_BUDGET // bytes_per_row))
    tile_r = max(g, (tile_r // g) * g)
    if rows <= tile_r:
        tile_r = rows   # full-dim block always satisfies the (8,128) rule
    # TODO(synk): vocab-scale feat (feat*g*bytes > VMEM) needs a two-pass /
    # online-softmax with feature tiling; single-pass kernel assumes one row
    # granule fits in VMEM.

    grid = (pl.cdiv(rows, tile_r),)
    return pl.pallas_call(
        _softmax_lane_kernel,
        out_shape=jax.ShapeDtypeStruct((rows, feat), dtype),
        grid_spec=pltpu.PrefetchScalarGridSpec(
            num_scalar_prefetch=0,
            grid=grid,
            in_specs=[pl.BlockSpec((tile_r, feat), lambda i: (i, 0))],
            out_specs=pl.BlockSpec((tile_r, feat), lambda i: (i, 0)),
        ),
        compiler_params=pltpu.CompilerParams(
            dimension_semantics=("parallel",),
            vmem_limit_bytes=_vmem_limit(tile_r * feat, dtype),
        ),
        cost_estimate=_cost_estimate(rows * feat, dtype),
    )(x2)


# ----------------------------------------------------------------------------
# Mid path: softmax over the middle axis of a (pre, C, post) slab (C small).
# Keeps `post` lane-dense; no transposes.
# ----------------------------------------------------------------------------
def _softmax_mid_kernel(x_ref, o_ref):
    x = x_ref[...].astype(jnp.float32)
    m = jnp.max(x, axis=1, keepdims=True)
    e = jnp.exp(x - m)
    s = jnp.sum(e, axis=1, keepdims=True)
    inv = pl.reciprocal(s, approx=False)
    o_ref[...] = (e * inv).astype(o_ref.dtype)


def _softmax_mid(x3: jax.Array) -> jax.Array:
    pre, c, post = x3.shape
    dtype = x3.dtype
    bpe = _bytes_per_element_in_flight(dtype)

    # Lane tile: full `post` when it fits the budget, else a multiple of 128.
    if post <= _LANE or post * c * bpe <= _TILE_VMEM_BUDGET:
        tile_post = post
    else:
        tile_post = max(_LANE, (_TILE_VMEM_BUDGET // (c * bpe * _LANE)) * _LANE)
        tile_post = min(tile_post, post)

    per_pre = max(1, c * tile_post * bpe)
    tile_pre = max(1, min(pre, _TILE_VMEM_BUDGET // per_pre, 512))

    grid = (pl.cdiv(pre, tile_pre), pl.cdiv(post, tile_post))
    return pl.pallas_call(
        _softmax_mid_kernel,
        out_shape=jax.ShapeDtypeStruct((pre, c, post), dtype),
        grid_spec=pltpu.PrefetchScalarGridSpec(
            num_scalar_prefetch=0,
            grid=grid,
            in_specs=[pl.BlockSpec((tile_pre, c, tile_post),
                                   lambda i, j: (i, 0, j))],
            out_specs=pl.BlockSpec((tile_pre, c, tile_post),
                                   lambda i, j: (i, 0, j)),
        ),
        compiler_params=pltpu.CompilerParams(
            dimension_semantics=("parallel", "parallel"),
            vmem_limit_bytes=_vmem_limit(tile_pre * c * tile_post, dtype),
        ),
        cost_estimate=_cost_estimate(pre * c * post, dtype),
    )(x3)


# ----------------------------------------------------------------------------
# Wrapper reproducing torch.nn.Softmax forward semantics.
# ----------------------------------------------------------------------------
@functools.partial(jax.jit, static_argnames=("dim",))
def pallas_softmax(x: jax.Array, dim=None) -> jax.Array:
    # torch's F.softmax(input, dim=None) default-axis rule.
    if dim is None:
        dim = 0 if x.ndim in (0, 1, 3) else 1
    if x.ndim == 0:
        return jnp.ones_like(x)   # softmax of a scalar is 1

    dim = dim % x.ndim
    shape = x.shape
    c = shape[dim]
    post = int(math.prod(shape[dim + 1:]))
    pre = int(math.prod(shape[:dim]))

    bpe = _bytes_per_element_in_flight(x.dtype)
    use_mid = (dim != x.ndim - 1
               and post > 1
               and c * _LANE * bpe <= _TILE_VMEM_BUDGET)

    if use_mid:
        # Pure reshape (no HBM transpose): merge leading / trailing dims.
        out3 = _softmax_mid(x.reshape(pre, c, post))
        return out3.reshape(shape)

    # Lane path: reduce axis moved to last (no-op when already last).
    x_moved = jnp.moveaxis(x, dim, -1)
    moved_shape = x_moved.shape
    rows = int(math.prod(moved_shape[:-1]))
    out2 = _softmax_lane(x_moved.reshape(rows, c))
    return jnp.moveaxis(out2.reshape(moved_shape), -1, dim)


class Softmax:
    """JAX/Pallas mirror of the PyTorch Softmax module's forward pass."""

    def __init__(self, dim=None, use_functional: bool = True):
        self.dim = dim
        self.use_F = use_functional  # both branches are mathematically identical

    def __call__(self, x: jax.Array) -> jax.Array:
        return pallas_softmax(x, dim=self.dim)


if __name__ == "__main__":
    key = jax.random.PRNGKey(0)

    # 1) NCHW-like input, dim=None -> torch rule gives dim=1 (mid path, C=4).
    x = jax.random.normal(key, (2, 4, 16, 16), dtype=jnp.float32)
    out = jax.block_until_ready(Softmax(dim=None)(x))
    ref = jax.nn.softmax(x, axis=1)
    assert out.shape == x.shape and out.dtype == x.dtype
    assert jnp.allclose(out, ref, atol=1e-6, rtol=1e-6)

    # 2) Explicit last-axis softmax (lane path), f32.
    k1, k2, k3 = jax.random.split(key, 3)
    y = jax.random.normal(k1, (2, 8, 32), dtype=jnp.float32)
    out2 = jax.block_until_ready(Softmax(dim=-1)(y))
    assert jnp.allclose(out2, jax.nn.softmax(y, axis=-1), atol=1e-6, rtol=1e-6)

    # 3) 3-D input, dim=None -> torch rule gives dim=0 (mid path, pre=1).
    z = jax.random.normal(k2, (4, 16, 16), dtype=jnp.float32)
    out3 = jax.block_until_ready(Softmax(dim=None)(z))
    assert jnp.allclose(out3, jax.nn.softmax(z, axis=0), atol=1e-6, rtol=1e-6)

    # 4) bf16 last-axis softmax (lane path, lane-dense feat=128).
    w = jax.random.normal(k3, (4, 8, 128), dtype=jnp.bfloat16)
    out4 = jax.block_until_ready(Softmax(dim=-1)(w))
    ref4 = jax.nn.softmax(w.astype(jnp.float32), axis=-1).astype(jnp.bfloat16)
    assert out4.dtype == jnp.bfloat16
    assert jnp.allclose(out4.astype(jnp.float32), ref4.astype(jnp.float32),
                        atol=1e-2, rtol=1e-2)

    print("KERNEL_OK")
</pallas_src>

<mosaic_0001>
module attributes {stable_mosaic.version = 11 : i64} {
  func.func @_softmax_mid_kernel(%arg0: i32, %arg1: i32, %arg2: memref<2x4x256xf32, #tpu.memory_space<vmem>>, %arg3: memref<2x4x256xf32, #tpu.memory_space<vmem>>) attributes {dimension_semantics = [#tpu.dimension_semantics<parallel>, #tpu.dimension_semantics<parallel>], iteration_bounds = array<i64: 1, 1>, scalar_prefetch = 0 : i64, scratch_operands = 0 : i64, tpu.core_type = #tpu.core_type<tc>, window_params = [{transform_indices = @transform_0, window_bounds = array<i64: 2, 4, 256>}, {transform_indices = @transform_1, window_bounds = array<i64: 2, 4, 256>}]} {
    %c0 = arith.constant 0 : index
    %c0_0 = arith.constant 0 : index
    %c0_1 = arith.constant 0 : index
    %0 = vector.load %arg2[%c0, %c0_0, %c0_1] : memref<2x4x256xf32, #tpu.memory_space<vmem>>, vector<2x4x256xf32>
    %cst = arith.constant dense<0xFF800000> : vector<2x256xf32>
    %1 = vector.multi_reduction <maximumf>, %0, %cst [1] : vector<2x4x256xf32> to vector<2x256xf32>
    %2 = vector.shape_cast %1 : vector<2x256xf32> to vector<2x1x256xf32>
    %3 = vector.broadcast %2 : vector<2x1x256xf32> to vector<2x4x256xf32>
    %4 = arith.subf %0, %3 : vector<2x4x256xf32>
    %5 = math.exp %4 : vector<2x4x256xf32>
    %cst_2 = arith.constant dense<0.000000e+00> : vector<2x256xf32>
    %6 = vector.multi_reduction <add>, %5, %cst_2 [1] : vector<2x4x256xf32> to vector<2x256xf32>
    %7 = vector.shape_cast %6 : vector<2x256xf32> to vector<2x1x256xf32>
    %8 = tpu.reciprocal %7 : vector<2x1x256xf32> -> vector<2x1x256xf32>
    %9 = vector.broadcast %8 : vector<2x1x256xf32> to vector<2x4x256xf32>
    %10 = arith.mulf %5, %9 : vector<2x4x256xf32>
    %c0_3 = arith.constant 0 : index
    %c0_4 = arith.constant 0 : index
    %c0_5 = arith.constant 0 : index
    %11 = vector.load %arg3[%c0_3, %c0_4, %c0_5] : memref<2x4x256xf32, #tpu.memory_space<vmem>>, vector<2x4x256xf32>
    tpu.vector_store %arg3[%c0_3, %c0_4, %c0_5], %10 {strides = array<i32>} : memref<2x4x256xf32, #tpu.memory_space<vmem>>, vector<2x4x256xf32>,
    return
  }
  func.func @transform_0(%arg0: i32, %arg1: i32) -> (i32, i32, i32) {
    %c0_i32 = arith.constant 0 : i32
    %c0_i32_0 = arith.constant 0 : i32
    return %arg0, %c0_i32, %arg1 : i32, i32, i32
  }
  func.func @transform_1(%arg0: i32, %arg1: i32) -> (i32, i32, i32) {
    %c0_i32 = arith.constant 0 : i32
    %c0_i32_0 = arith.constant 0 : i32
    return %arg0, %c0_i32, %arg1 : i32, i32, i32
  }
}

</mosaic_0001>

<bundles_post_ra>
// kernel: pallas_softmax.1
= control target key start
LH: loop header
LB: loop body
LE: loop exit
PB: predicated region body
PF: predicated region fallthrough
CT: control target
= control target key end

     0   :  { %vm16_vm0 = vcmask 1043456   ;;  %s157_s0 = inlined_call_operand.vmem [shape: f32[2,4,256], index: 0, kind: input, shape index: {}]   ;;  %s158_s1 = inlined_call_operand.vmem [shape: f32[2,4,256], index: 1, kind: output, shape index: {}]  }
   0x1   :  { %v8_v0 = vld [vmem:[%s157_s0] sm:$0xff]  ;;  %v9_v1 = vld [vmem:[%s157_s0 + $0x8] sm:$0xff] }
   0x2   :  { %v12_v2 = vcombine.high %v8_v0, %v8_v0  ;;  %v17_v3 = vsel %vm16_vm0, %v8_v0, -inf  ;;  %v13_v4 = vcombine.high %v9_v1, %v9_v1  ;;  %v31_v5 = vsel %vm16_vm0, %v9_v1, -inf }
   0x3   :  { %v18_v6 = vrot.slane %v17_v3, 4  ;;  %v32_v7 = vrot.slane %v31_v5, 4 }
   0x4   :  { %v24_v8 = vsel %vm16_vm0, %v12_v2, -inf  ;;  %v38_v9 = vsel %vm16_vm0, %v13_v4, -inf }
   0x5   :  { %v19_v10 = vmax.f32 %v17_v3, %v18_v6  ;;  %v25_v11 = vrot.slane %v24_v8, 4  ;;  %v33_v12 = vmax.f32 %v31_v5, %v32_v7  ;;  %v39_v13 = vrot.slane %v38_v9, 4 }
   0x7   :  { %v20_v14 = vrot.slane %v19_v10, 2  ;;  %v26_v15 = vmax.f32 %v24_v8, %v25_v11  ;;  %v34_v16 = vrot.slane %v33_v12, 2  ;;  %v40_v17 = vmax.f32 %v38_v9, %v39_v13 }
   0x9   :  { %v21_v18 = vmax.f32 %v19_v10, %v20_v14  ;;  %v27_v19 = vrot.slane %v26_v15, 2  ;;  %v35_v20 = vmax.f32 %v33_v12, %v34_v16  ;;  %v41_v21 = vrot.slane %v40_v17, 2 }
   0xb   :  { %v22_v22 = vrot.slane %v21_v18, 1  ;;  %v28_v23 = vmax.f32 %v26_v15, %v27_v19  ;;  %v36_v24 = vrot.slane %v35_v20, 1  ;;  %v42_v25 = vmax.f32 %v40_v17, %v41_v21 }
   0xd   :  { %v23_v26 = vmax.f32 %v21_v18, %v22_v22  ;;  %v29_v27 = vrot.slane %v28_v23, 1  ;;  %v37_v28 = vmax.f32 %v35_v20, %v36_v24  ;;  %v43_v29 = vrot.slane %v42_v25, 1 }
   0xf   :  { %v30_v30 = vmax.f32 %v28_v23, %v29_v27  ;;  %v44_v31 = vmax.f32 %v42_v25, %v43_v29 }
  0x11   :  { %v49_v32 = vcombine.low %v23_v26, %v30_v30  ;;  %v50_v33 = vcombine.low %v37_v28, %v44_v31 }
  0x13   :  { %v53_v34 = vsub.f32 %v8_v0, %v49_v32  ;;  %v54_v35 = vsub.f32 %v9_v1, %v50_v33 }
  0x15   :  { %v55_v36 = vmul.f32 1.442695, %v53_v34  ;;  %v57_v37 = vmul.f32 1.442695, %v54_v35 }
  0x17   :  { %115 = vpow2.f32 %v55_v36 }
  0x18   :  { %117 = vpow2.f32 %v57_v37 }
  0x21   :  { %v116_v38 = vpop.eup %115 }
  0x22   :  { %v118_v39 = vpop.eup %117  ;;  %v61_v40 = vcombine.high %v116_v38, %v116_v38  ;;  %v65_v41 = vsel %vm16_vm0, %v116_v38, 0.0 }
  0x23   :  { %v66_v42 = vrot.slane %v65_v41, 4  ;;  %v62_v43 = vcombine.high %v118_v39, %v118_v39  ;;  %v79_v44 = vsel %vm16_vm0, %v118_v39, 0.0 }
  0x24   :  { %v72_v45 = vsel %vm16_vm0, %v61_v40, 0.0  ;;  %v80_v46 = vrot.slane %v79_v44, 4 }
  0x25   :  { %v67_v47 = vadd.f32 %v66_v42, %v65_v41  ;;  %v73_v48 = vrot.slane %v72_v45, 4  ;;  %v86_v49 = vsel %vm16_vm0, %v62_v43, 0.0 }
  0x26   :  { %v81_v50 = vadd.f32 %v80_v46, %v79_v44  ;;  %v87_v51 = vrot.slane %v86_v49, 4 }
  0x27   :  { %v68_v52 = vrot.slane %v67_v47, 2  ;;  %v74_v53 = vadd.f32 %v73_v48, %v72_v45 }
  0x28   :  { %v82_v54 = vrot.slane %v81_v50, 2  ;;  %v88_v55 = vadd.f32 %v87_v51, %v86_v49 }
  0x29   :  { %v69_v56 = vadd.f32 %v68_v52, %v67_v47  ;;  %v75_v57 = vrot.slane %v74_v53, 2 }
  0x2a   :  { %v83_v58 = vadd.f32 %v82_v54, %v81_v50  ;;  %v89_v59 = vrot.slane %v88_v55, 2 }
  0x2b   :  { %v70_v60 = vrot.slane %v69_v56, 1  ;;  %v76_v61 = vadd.f32 %v75_v57, %v74_v53 }
  0x2c   :  { %v84_v62 = vrot.slane %v83_v58, 1  ;;  %v90_v63 = vadd.f32 %v89_v59, %v88_v55 }
  0x2d   :  { %v71_v0 = vadd.f32 %v70_v60, %v69_v56  ;;  %v77_v1 = vrot.slane %v76_v61, 1 }
  0x2e   :  { %v85_v2 = vadd.f32 %v84_v62, %v83_v58  ;;  %v91_v3 = vrot.slane %v90_v63, 1 }
  0x2f   :  { %v78_v4 = vadd.f32 %v77_v1, %v76_v61  ;;  %119 = vrcp.f32 %v71_v0 }
  0x30   :  { %v92_v5 = vadd.f32 %v91_v3, %v90_v63  ;;  %121 = vrcp.f32 %v85_v2 }
  0x31   :  { %123 = vrcp.f32 %v78_v4 }
  0x32   :  { %125 = vrcp.f32 %v92_v5 }
  0x39   :  { %v120_v6 = vpop.eup %119 }
  0x3a   :  { %v122_v7 = vpop.eup %121 }
  0x3b   :  { %v124_v8 = vpop.eup %123 }
  0x3c   :  { %v126_v9 = vpop.eup %125  ;;  %v101_v10 = vcombine.low %v120_v6, %v124_v8 }
  0x3d   :  { %v102_v11 = vcombine.low %v122_v7, %v126_v9 }
  0x3e   :  { %v105_v12 = vmul.f32 %v116_v38, %v101_v10 }
  0x3f   :  { %v106_v13 = vmul.f32 %v118_v39, %v102_v11 }
  0x40   :  { %107 = vst [vmem:[%s158_s1] sm:$0xff] %v105_v12 }
  0x41   :  { %108 = vst [vmem:[%s158_s1 + $0x8] sm:$0xff] %v106_v13 }

</bundles_post_ra>
